<compile_context>
chip_gen: v5e
topology: v5e:2x2
jax: 0.10.0
libtpu: 0.0.40
codegen_flags: <defaults>
</compile_context>

<pallas_src>
import functools

import jax
import jax.numpy as jnp
from jax import lax
from jax.experimental import pallas as pl
from jax.experimental.pallas import tpu as pltpu

EPS = 1e-5
# contract last dims of both operands: (d_out, K) x (N, K) -> (d_out, N)
_TRANS_B = (((1,), (1,)), ((), ()))


def _ceil_to(a, b):
    return -(-a // b) * b


def _vmem_budget_bytes():
    """Per-TensorCore VMEM budget: physical capacity (64 MiB/TC on v7x, 128 MiB on
    v5e/v6e) minus ~25% headroom for compiler scratch / double buffering."""
    try:
        cap = pltpu.get_tpu_info().vmem_capacity_bytes
    except Exception:
        cap = 64 * 1024 * 1024  # conservative fallback (v7x per-TC)
    return int(cap * 3 // 4)


def _cost(flops, bytes_accessed, transcendentals=0):
    return pl.CostEstimate(flops=int(flops), transcendentals=int(transcendentals),
                           bytes_accessed=int(bytes_accessed))


def _single_shot_vmem_bytes(n, x_dim, d1, d2, dh, msize):
    """Rough single-shot VMEM footprint using VMEM tile padding (8 sublanes /
    128 lanes) and the actual matmul-operand itemsize."""
    lanes = _ceil_to(max(n, 1), 128)
    b = _ceil_to(n, 8) * _ceil_to(x_dim, 128) * msize                # x block (native)
    b += _ceil_to(d1, 8) * _ceil_to(x_dim, 128) * msize              # W1
    b += _ceil_to(d2, 8) * _ceil_to(d1, 128) * msize                 # W2
    b += _ceil_to(dh, 8) * _ceil_to(d2, 128) * msize                 # fused heads
    b += _ceil_to(max(d1, d2, dh), 8) * 128 * 4                      # packed params
    b += (_ceil_to(d1, 8) + _ceil_to(d2, 8)) * lanes * (4 + msize)   # h (f32) + a (md)
    b += _ceil_to(dh, 8) * lanes * 4                                 # head output
    return 2 * b                                                     # liveness fudge


# --------------------------------------------------------------------------- #
# Kernels
# --------------------------------------------------------------------------- #
def _bn_relu(h, g_col, b_col, inv_n):
    """Training-mode BatchNorm (+ReLU) folded into one scale/shift.
    h: (d, N) f32, batch on the lane axis, pre-activation WITHOUT linear bias."""
    mu = jnp.sum(h, axis=-1, keepdims=True) * inv_n
    ex2 = jnp.sum(h * h, axis=-1, keepdims=True) * inv_n
    var = jnp.maximum(ex2 - mu * mu, 0.0)     # clamp: f32 cancellation can go < 0
    scale = g_col * lax.rsqrt(var + EPS)
    shift = b_col - mu * scale
    return jnp.maximum(h * scale + shift, 0.0)


def _fused_kernel(x_ref, w1_ref, w2_ref, wh_ref, p_ref, out_ref, *, d1, d2, dh):
    """Single-shot fused enc(Linear+BN+ReLU x2) + [fc ; shift_cls] heads.
    x stays in its native (N, x_dim) layout; activations are (features, batch)."""
    inv_n = 1.0 / x_ref.shape[0]
    # layer 1: h1^T = W1 @ x^T  (trans-B MXU dot; no wrapper / in-kernel transpose)
    h1 = lax.dot_general(w1_ref[...], x_ref[...], _TRANS_B,
                         preferred_element_type=jnp.float32)            # (d1, N)
    a1 = _bn_relu(h1, p_ref[0:d1, 0:1], p_ref[0:d1, 1:2], inv_n).astype(w2_ref.dtype)
    # layer 2
    h2 = jnp.dot(w2_ref[...], a1, preferred_element_type=jnp.float32)   # (d2, N)
    a2 = _bn_relu(h2, p_ref[0:d2, 2:3], p_ref[0:d2, 3:4], inv_n).astype(wh_ref.dtype)
    # fused heads: one MXU pass, lane-dense (dh, N) output
    out_ref[...] = (jnp.dot(wh_ref[...], a2, preferred_element_type=jnp.float32)
                    + p_ref[0:dh, 4:5])


def _stats1_kernel(x_ref, w1_ref, s_ref, q_ref):
    """Pass 1 of the tiled pipeline: accumulate sum / sum-of-squares of h1."""
    @pl.when(pl.program_id(0) == 0)
    def _():
        s_ref[...] = jnp.zeros_like(s_ref)
        q_ref[...] = jnp.zeros_like(q_ref)
    h1 = lax.dot_general(w1_ref[...], x_ref[...], _TRANS_B,
                         preferred_element_type=jnp.float32)            # (d1, TN)
    s_ref[...] += jnp.sum(h1, axis=-1, keepdims=True)
    q_ref[...] += jnp.sum(h1 * h1, axis=-1, keepdims=True)


def _stats2_kernel(x_ref, w1_ref, w2_ref, ss1_ref, s_ref, q_ref):
    """Pass 2: recompute h1 (cheap, DMA-bound anyway), normalize, accumulate h2 stats."""
    @pl.when(pl.program_id(0) == 0)
    def _():
        s_ref[...] = jnp.zeros_like(s_ref)
        q_ref[...] = jnp.zeros_like(q_ref)
    h1 = lax.dot_general(w1_ref[...], x_ref[...], _TRANS_B,
                         preferred_element_type=jnp.float32)
    a1 = jnp.maximum(h1 * ss1_ref[:, 0:1] + ss1_ref[:, 1:2], 0.0).astype(w2_ref.dtype)
    h2 = jnp.dot(w2_ref[...], a1, preferred_element_type=jnp.float32)   # (d2, TN)
    s_ref[...] += jnp.sum(h2, axis=-1, keepdims=True)
    q_ref[...] += jnp.sum(h2 * h2, axis=-1, keepdims=True)


def _finalize_kernel(x_ref, w1_ref, w2_ref, wh_ref, ss1_ref, ss2_ref, bh_ref, out_ref):
    """Pass 3: normalize both layers with the global stats and emit the fused heads."""
    h1 = lax.dot_general(w1_ref[...], x_ref[...], _TRANS_B,
                         preferred_element_type=jnp.float32)
    a1 = jnp.maximum(h1 * ss1_ref[:, 0:1] + ss1_ref[:, 1:2], 0.0).astype(w2_ref.dtype)
    h2 = jnp.dot(w2_ref[...], a1, preferred_element_type=jnp.float32)
    a2 = jnp.maximum(h2 * ss2_ref[:, 0:1] + ss2_ref[:, 1:2], 0.0).astype(wh_ref.dtype)
    out_ref[...] = (jnp.dot(wh_ref[...], a2, preferred_element_type=jnp.float32)
                    + bh_ref[...])


# --------------------------------------------------------------------------- #
# Wrappers
# --------------------------------------------------------------------------- #
def _fold_bn(s, q, n, gamma, beta):
    """Turn accumulated (sum, sum-of-squares) into one (scale, shift) pair per feature."""
    mu = s[:, 0] / n
    var = jnp.maximum(q[:, 0] / n - mu * mu, 0.0)
    scale = gamma * lax.rsqrt(var + EPS)
    shift = beta - mu * scale
    return jnp.stack([scale, shift], axis=1).astype(jnp.float32)        # (d, 2)


def _feat_encoder_tiled(x_md, w1_md, w2_md, wh_md, w2_f32, g1, be1, g2, be2, bf, bs,
                        *, n, tile_n, budget, msize):
    """3-pass tiled pipeline for batches that do not fit the single-shot VMEM budget."""
    N = n
    x_dim = x_md.shape[1]
    d1, d2, dh = w1_md.shape[0], w2_md.shape[0], wh_md.shape[0]
    t = pl.cdiv(N, tile_n)
    n_pad = t * tile_n
    if n_pad != N:
        # Zero rows -> the padded h1 columns are exactly 0 (no linear bias), so
        # layer-1 stats need no correction; layer-2 stats are corrected below.
        x_md = jnp.pad(x_md, ((0, n_pad - N), (0, 0)))

    x_spec = pl.BlockSpec((tile_n, x_dim), lambda i: (i, 0))

    def const(a):
        return pl.BlockSpec(a.shape, lambda i: (0, 0))

    def acc_spec(d):
        return pl.BlockSpec((d, 1), lambda i: (0, 0))

    def stat_shape(d):
        return jax.ShapeDtypeStruct((d, 1), jnp.float32)

    arb = pltpu.CompilerParams(dimension_semantics=("arbitrary",),
                               vmem_limit_bytes=budget)
    par = pltpu.CompilerParams(dimension_semantics=("parallel",),
                               vmem_limit_bytes=budget)
    x_bytes = n_pad * x_dim * msize

    # --- pass 1: batch sum / sum-of-squares of h1 ------------------------------
    # TODO(synk): on v7x the stats passes could be split across both TensorCores
    # (core_parallel + CMEM/core_barrier partial-sum merge); currently only the
    # finalize pass is core-parallel.
    s1, q1 = pl.pallas_call(
        _stats1_kernel,
        out_shape=(stat_shape(d1), stat_shape(d1)),
        grid=(t,),
        in_specs=[x_spec, const(w1_md)],
        out_specs=(acc_spec(d1), acc_spec(d1)),
        compiler_params=arb,
        cost_estimate=_cost(2 * n_pad * x_dim * d1,
                            x_bytes + w1_md.size * msize + 2 * d1 * 4),
    )(x_md, w1_md)
    ss1 = _fold_bn(s1, q1, N, g1, be1)                                   # (d1, 2)

    # --- pass 2: batch stats of h2 ---------------------------------------------
    s2, q2 = pl.pallas_call(
        _stats2_kernel,
        out_shape=(stat_shape(d2), stat_shape(d2)),
        grid=(t,),
        in_specs=[x_spec, const(w1_md), const(w2_md), const(ss1)],
        out_specs=(acc_spec(d2), acc_spec(d2)),
        compiler_params=arb,
        cost_estimate=_cost(2 * n_pad * (x_dim * d1 + d1 * d2),
                            x_bytes + (w1_md.size + w2_md.size) * msize + 2 * d2 * 4),
    )(x_md, w1_md, w2_md, ss1)
    if n_pad != N:
        # Padded batch columns of h2 are the constant column c = W2 @ relu(shift1):
        # correct the sums analytically instead of masking a1 per element.
        c = jnp.dot(w2_f32, jnp.maximum(ss1[:, 1], 0.0))                 # (d2,)
        pad = float(n_pad - N)
        s2 = s2 - pad * c[:, None]
        q2 = q2 - pad * (c * c)[:, None]
    ss2 = _fold_bn(s2, q2, N, g2, be2)                                   # (d2, 2)

    # --- pass 3: normalize + fused heads ("parallel" -> v7x dual-TC) ------------
    bh = jnp.concatenate([bf, bs])[:, None].astype(jnp.float32)          # (dh, 1)
    out_t = pl.pallas_call(
        _finalize_kernel,
        out_shape=jax.ShapeDtypeStruct((dh, n_pad), jnp.float32),
        grid=(t,),
        in_specs=[x_spec, const(w1_md), const(w2_md), const(wh_md),
                  const(ss1), const(ss2), const(bh)],
        out_specs=pl.BlockSpec((dh, tile_n), lambda i: (0, i)),
        compiler_params=par,
        cost_estimate=_cost(2 * n_pad * (x_dim * d1 + d1 * d2 + d2 * dh),
                            x_bytes + (w1_md.size + w2_md.size + wh_md.size) * msize
                            + dh * n_pad * 4),
    )(x_md, w1_md, w2_md, wh_md, ss1, ss2, bh)
    return out_t[:, :N]


def feat_encoder(x, params, *, matmul_dtype=jnp.bfloat16, tile_n=None):
    """FeatEncoder forward (num_layers=3, bias=True, batch_norm=True, training BN).

    params are PyTorch layout: Linear weight = (out, in), vectors = (d,).
    Returns (z, z_shift) with shapes (N, z_dim), (N, 2).

    matmul_dtype : MXU operand dtype (bf16 default -- MXU-native on v5e/v6e/v7x and
        halves HBM/VMEM bytes of the dominant operand when x is produced in bf16;
        BN statistics / scale / shift / head bias are always f32).
    tile_n : force the tiled 3-pass pipeline with this batch-tile size (multiple of
        128).  Default: a single fused kernel when the batch fits the per-generation
        VMEM budget, otherwise 1024-row tiles.
    """
    (w1, b1, g1, be1, w2, b2, g2, be2, wf, bf, ws, bs) = params
    del b1, b2  # cancelled exactly by training-mode BN mean subtraction (NOT eval BN)
    N, x_dim = x.shape
    d1, d2 = w1.shape[0], w2.shape[0]
    z_dim = wf.shape[0]
    dh = z_dim + 2
    budget = _vmem_budget_bytes()
    msize = jnp.dtype(matmul_dtype).itemsize

    # Operands in matmul dtype.  x keeps its native (N, x_dim) HBM layout -- no
    # wrapper transpose/pad; the cast is a no-op for bf16 inputs and fuses with the
    # producer of x under jit otherwise.
    x_md = x.astype(matmul_dtype)
    w1_md = w1.astype(matmul_dtype)
    w2_md = w2.astype(matmul_dtype)
    wh_md = jnp.concatenate([wf, ws], axis=0).astype(matmul_dtype)   # fused heads

    est = _single_shot_vmem_bytes(N, x_dim, d1, d2, dh, msize)
    if tile_n is None and est <= budget:
        # ---- single-shot fused path (whole batch resident: BN needs global stats).
        # Runs on one TensorCore; batches that need more VMEM route to the tiled
        # pipeline below, whose finalize pass is core-parallel on v7x.
        p_rows = _ceil_to(max(d1, d2, dh), 8)
        packed = jnp.zeros((p_rows, 8), jnp.float32)
        packed = packed.at[:d1, 0].set(g1).at[:d1, 1].set(be1)
        packed = packed.at[:d2, 2].set(g2).at[:d2, 3].set(be2)
        packed = packed.at[:z_dim, 4].set(bf).at[z_dim:dh, 4].set(bs)

        def full_spec(shape):
            return pl.BlockSpec(shape, lambda: (0,) * len(shape))

        inputs = (x_md, w1_md, w2_md, wh_md, packed)
        kernel = functools.partial(_fused_kernel, d1=d1, d2=d2, dh=dh)
        flops = 2 * N * (x_dim * d1 + d1 * d2 + d2 * dh)
        bytes_acc = (N * x_dim * msize
                     + (d1 * x_dim + d2 * d1 + dh * d2) * msize
                     + packed.size * 4 + dh * N * 4)
        out_t = pl.pallas_call(
            kernel,
            out_shape=jax.ShapeDtypeStruct((dh, N), jnp.float32),
            grid=(),
            in_specs=[full_spec(a.shape) for a in inputs],
            out_specs=full_spec((dh, N)),
            compiler_params=pltpu.CompilerParams(vmem_limit_bytes=budget),
            cost_estimate=_cost(flops, bytes_acc, transcendentals=d1 + d2),
        )(*inputs)
    else:
        tn = tile_n if tile_n is not None else 1024
        assert tn % 128 == 0, "tile_n must be a multiple of 128 lanes"
        out_t = _feat_encoder_tiled(
            x_md, w1_md, w2_md, wh_md, w2.astype(jnp.float32),
            g1, be1, g2, be2, bf, bs,
            n=N, tile_n=tn, budget=budget, msize=msize)

    # out_t is the lane-dense (z_dim+2, N) slab; only this small head output is
    # transposed back to PyTorch layout (consumers that can use the transposed slab
    # should take out_t directly / fuse this under jit).
    z = out_t[:z_dim, :].T
    z_shift = out_t[z_dim:, :].T
    return z, z_shift


# --------------------------------------------------------------------------- #
# Test harness
# --------------------------------------------------------------------------- #
def make_params(key, x_dim, z_dim):
    """Deterministic synthetic parameters in PyTorch layout (weight = (out, in))."""
    ks = jax.random.split(key, 12)
    d0, d1, d2 = x_dim, x_dim // 2, x_dim // 4

    def n(k, shape, s=0.1):
        return jax.random.normal(k, shape, jnp.float32) * s

    w1, b1 = n(ks[0], (d1, d0)), n(ks[1], (d1,))
    g1, be1 = 1.0 + n(ks[2], (d1,)), n(ks[3], (d1,))
    w2, b2 = n(ks[4], (d2, d1)), n(ks[5], (d2,))
    g2, be2 = 1.0 + n(ks[6], (d2,)), n(ks[7], (d2,))
    wf, bf = n(ks[8], (z_dim, d2)), n(ks[9], (z_dim,))
    ws, bs = n(ks[10], (2, d2)), n(ks[11], (2,))
    return (w1, b1, g1, be1, w2, b2, g2, be2, wf, bf, ws, bs)


def reference(x, params):
    """Pure-JAX reference mirroring the PyTorch forward (training-mode BN)."""
    (w1, b1, g1, be1, w2, b2, g2, be2, wf, bf, ws, bs) = params

    def bn_relu(h, g, be):
        mu = jnp.mean(h, axis=0, keepdims=True)
        var = jnp.mean((h - mu) ** 2, axis=0, keepdims=True)
        return jnp.maximum((h - mu) * lax.rsqrt(var + EPS) * g + be, 0.0)

    h = bn_relu(x @ w1.T + b1, g1, be1)
    h = bn_relu(h @ w2.T + b2, g2, be2)
    return h @ wf.T + bf, h @ ws.T + bs


if __name__ == "__main__":
    x_dim, z_dim = 32, 16
    key = jax.random.PRNGKey(0)
    kp, kx1, kx2 = jax.random.split(key, 3)
    params = make_params(kp, x_dim, z_dim)

    # 1) small batch -> single fused kernel, f32 MXU operands (tight check)
    x_small = jax.random.normal(kx1, (8, x_dim), jnp.float32)
    z, zs = feat_encoder(x_small, params, matmul_dtype=jnp.float32)
    jax.block_until_ready((z, zs))
    z_ref, zs_ref = reference(x_small, params)
    assert z.shape == (8, z_dim) and zs.shape == (8, 2)
    assert jnp.allclose(z, z_ref, atol=1e-4, rtol=1e-4)
    assert jnp.allclose(zs, zs_ref, atol=1e-4, rtol=1e-4)

    # 2) same batch through the default bf16 MXU-operand path (loose check)
    zb, zsb = feat_encoder(x_small, params)
    jax.block_until_ready((zb, zsb))
    assert jnp.allclose(zb, z_ref, atol=5e-2, rtol=5e-2)
    assert jnp.allclose(zsb, zs_ref, atol=5e-2, rtol=5e-2)

    # 3) larger batch forced through the tiled 3-pass pipeline (2 x 128-row tiles)
    x_big = jax.random.normal(kx2, (256, x_dim), jnp.float32)
    zt, zst = feat_encoder(x_big, params, matmul_dtype=jnp.float32, tile_n=128)
    jax.block_until_ready((zt, zst))
    zt_ref, zst_ref = reference(x_big, params)
    assert zt.shape == (256, z_dim) and zst.shape == (256, 2)
    assert jnp.allclose(zt, zt_ref, atol=1e-4, rtol=1e-4)
    assert jnp.allclose(zst, zst_ref, atol=1e-4, rtol=1e-4)

    print("KERNEL_OK")
</pallas_src>

<mosaic_0001>
module attributes {stable_mosaic.version = 11 : i64} {
  func.func @_fused_kernel(%arg0: memref<8x32xf32, #tpu.memory_space<vmem>>, %arg1: memref<16x32xf32, #tpu.memory_space<vmem>>, %arg2: memref<8x16xf32, #tpu.memory_space<vmem>>, %arg3: memref<18x8xf32, #tpu.memory_space<vmem>>, %arg4: memref<24x8xf32, #tpu.memory_space<vmem>>, %arg5: memref<18x8xf32, #tpu.memory_space<vmem>>) attributes {dimension_semantics = [], scalar_prefetch = 0 : i64, scratch_operands = 0 : i64, tpu.core_type = #tpu.core_type<tc>} {
    %c0 = arith.constant 0 : index
    %c0_0 = arith.constant 0 : index
    %0 = vector.load %arg1[%c0, %c0_0] : memref<16x32xf32, #tpu.memory_space<vmem>>, vector<16x32xf32>
    %c0_1 = arith.constant 0 : index
    %c0_2 = arith.constant 0 : index
    %1 = vector.load %arg0[%c0_1, %c0_2] : memref<8x32xf32, #tpu.memory_space<vmem>>, vector<8x32xf32>
    %cst = arith.constant dense<0.000000e+00> : vector<16x8xf32>
    %2 = tpu.matmul %0, %1, %cst {dimension_numbers = #tpu.dot_dimension_numbers<[1], [1], [0], [0], [0, 0, 1, 0], [], []>} : vector<16x32xf32>, vector<8x32xf32>, vector<16x8xf32> -> vector<16x8xf32>
    %c0_3 = arith.constant 0 : index
    %c0_4 = arith.constant 0 : index
    %3 = vector.load %arg4[%c0_3, %c0_4] : memref<24x8xf32, #tpu.memory_space<vmem>>, vector<16x1xf32>
    %c0_5 = arith.constant 0 : index
    %c1 = arith.constant 1 : index
    %4 = vector.load %arg4[%c0_5, %c1] : memref<24x8xf32, #tpu.memory_space<vmem>>, vector<16x1xf32>
    %cst_6 = arith.constant dense<0.000000e+00> : vector<16xf32>
    %5 = vector.multi_reduction <add>, %2, %cst_6 [1] : vector<16x8xf32> to vector<16xf32>
    %6 = vector.shape_cast %5 : vector<16xf32> to vector<16x1xf32>
    %cst_7 = arith.constant 1.250000e-01 : f32
    %7 = vector.broadcast %cst_7 : f32 to vector<16x1xf32>
    %8 = arith.mulf %6, %7 : vector<16x1xf32>
    %9 = arith.mulf %2, %2 : vector<16x8xf32>
    %cst_8 = arith.constant dense<0.000000e+00> : vector<16xf32>
    %10 = vector.multi_reduction <add>, %9, %cst_8 [1] : vector<16x8xf32> to vector<16xf32>
    %11 = vector.shape_cast %10 : vector<16xf32> to vector<16x1xf32>
    %cst_9 = arith.constant 1.250000e-01 : f32
    %12 = vector.broadcast %cst_9 : f32 to vector<16x1xf32>
    %13 = arith.mulf %11, %12 : vector<16x1xf32>
    %14 = arith.mulf %8, %8 : vector<16x1xf32>
    %15 = arith.subf %13, %14 : vector<16x1xf32>
    %cst_10 = arith.constant 0.000000e+00 : f32
    %16 = vector.broadcast %cst_10 : f32 to vector<16x1xf32>
    %17 = arith.maximumf %15, %16 : vector<16x1xf32>
    %cst_11 = arith.constant 9.99999974E-6 : f32
    %18 = vector.broadcast %cst_11 : f32 to vector<16x1xf32>
    %19 = arith.addf %17, %18 : vector<16x1xf32>
    %20 = math.rsqrt %19 : vector<16x1xf32>
    %21 = arith.mulf %3, %20 : vector<16x1xf32>
    %22 = arith.mulf %8, %21 : vector<16x1xf32>
    %23 = arith.subf %4, %22 : vector<16x1xf32>
    %24 = vector.broadcast %21 : vector<16x1xf32> to vector<16x8xf32>
    %25 = arith.mulf %2, %24 : vector<16x8xf32>
    %26 = vector.broadcast %23 : vector<16x1xf32> to vector<16x8xf32>
    %27 = arith.addf %25, %26 : vector<16x8xf32>
    %cst_12 = arith.constant 0.000000e+00 : f32
    %28 = vector.broadcast %cst_12 : f32 to vector<16x8xf32>
    %29 = arith.maximumf %27, %28 : vector<16x8xf32>
    %c0_13 = arith.constant 0 : index
    %c0_14 = arith.constant 0 : index
    %30 = vector.load %arg2[%c0_13, %c0_14] : memref<8x16xf32, #tpu.memory_space<vmem>>, vector<8x16xf32>
    %cst_15 = arith.constant dense<0.000000e+00> : vector<8x8xf32>
    %31 = tpu.matmul %30, %29, %cst_15 {dimension_numbers = #tpu.dot_dimension_numbers<[1], [0], [0], [1], [0, 0, 1, 1], [], []>} : vector<8x16xf32>, vector<16x8xf32>, vector<8x8xf32> -> vector<8x8xf32>
    %c0_16 = arith.constant 0 : index
    %c2 = arith.constant 2 : index
    %32 = vector.load %arg4[%c0_16, %c2] : memref<24x8xf32, #tpu.memory_space<vmem>>, vector<8x1xf32>
    %c0_17 = arith.constant 0 : index
    %c3 = arith.constant 3 : index
    %33 = vector.load %arg4[%c0_17, %c3] : memref<24x8xf32, #tpu.memory_space<vmem>>, vector<8x1xf32>
    %cst_18 = arith.constant dense<0.000000e+00> : vector<8xf32>
    %34 = vector.multi_reduction <add>, %31, %cst_18 [1] : vector<8x8xf32> to vector<8xf32>
    %35 = vector.shape_cast %34 : vector<8xf32> to vector<8x1xf32>
    %cst_19 = arith.constant 1.250000e-01 : f32
    %36 = vector.broadcast %cst_19 : f32 to vector<8x1xf32>
    %37 = arith.mulf %35, %36 : vector<8x1xf32>
    %38 = arith.mulf %31, %31 : vector<8x8xf32>
    %cst_20 = arith.constant dense<0.000000e+00> : vector<8xf32>
    %39 = vector.multi_reduction <add>, %38, %cst_20 [1] : vector<8x8xf32> to vector<8xf32>
    %40 = vector.shape_cast %39 : vector<8xf32> to vector<8x1xf32>
    %cst_21 = arith.constant 1.250000e-01 : f32
    %41 = vector.broadcast %cst_21 : f32 to vector<8x1xf32>
    %42 = arith.mulf %40, %41 : vector<8x1xf32>
    %43 = arith.mulf %37, %37 : vector<8x1xf32>
    %44 = arith.subf %42, %43 : vector<8x1xf32>
    %cst_22 = arith.constant 0.000000e+00 : f32
    %45 = vector.broadcast %cst_22 : f32 to vector<8x1xf32>
    %46 = arith.maximumf %44, %45 : vector<8x1xf32>
    %cst_23 = arith.constant 9.99999974E-6 : f32
    %47 = vector.broadcast %cst_23 : f32 to vector<8x1xf32>
    %48 = arith.addf %46, %47 : vector<8x1xf32>
    %49 = math.rsqrt %48 : vector<8x1xf32>
    %50 = arith.mulf %32, %49 : vector<8x1xf32>
    %51 = arith.mulf %37, %50 : vector<8x1xf32>
    %52 = arith.subf %33, %51 : vector<8x1xf32>
    %53 = vector.broadcast %50 : vector<8x1xf32> to vector<8x8xf32>
    %54 = arith.mulf %31, %53 : vector<8x8xf32>
    %55 = vector.broadcast %52 : vector<8x1xf32> to vector<8x8xf32>
    %56 = arith.addf %54, %55 : vector<8x8xf32>
    %cst_24 = arith.constant 0.000000e+00 : f32
    %57 = vector.broadcast %cst_24 : f32 to vector<8x8xf32>
    %58 = arith.maximumf %56, %57 : vector<8x8xf32>
    %c0_25 = arith.constant 0 : index
    %c0_26 = arith.constant 0 : index
    %59 = vector.load %arg3[%c0_25, %c0_26] : memref<18x8xf32, #tpu.memory_space<vmem>>, vector<18x8xf32>
    %cst_27 = arith.constant dense<0.000000e+00> : vector<18x8xf32>
    %60 = tpu.matmul %59, %58, %cst_27 {dimension_numbers = #tpu.dot_dimension_numbers<[1], [0], [0], [1], [0, 0, 1, 1], [], []>} : vector<18x8xf32>, vector<8x8xf32>, vector<18x8xf32> -> vector<18x8xf32>
    %c0_28 = arith.constant 0 : index
    %c4 = arith.constant 4 : index
    %61 = vector.load %arg4[%c0_28, %c4] : memref<24x8xf32, #tpu.memory_space<vmem>>, vector<18x1xf32>
    %62 = vector.broadcast %61 : vector<18x1xf32> to vector<18x8xf32>
    %63 = arith.addf %60, %62 : vector<18x8xf32>
    %c0_29 = arith.constant 0 : index
    %c0_30 = arith.constant 0 : index
    %64 = vector.load %arg5[%c0_29, %c0_30] : memref<18x8xf32, #tpu.memory_space<vmem>>, vector<18x8xf32>
    tpu.vector_store %arg5[%c0_29, %c0_30], %63 {strides = array<i32>} : memref<18x8xf32, #tpu.memory_space<vmem>>, vector<18x8xf32>,
    return
  }
}

</mosaic_0001>

<bundles_post_ra>
// kernel: tpu_custom_call.1
= control target key start
LH: loop header
LB: loop body
LE: loop exit
PB: predicated region body
PF: predicated region fallthrough
CT: control target
= control target key end

     0   :  { %vm23_vm0 = vcmask 261120   ;;  %vm58_vm1 = vcmask 64512   ;;  %v305_v11 = vmov 0   ;;  %s306_s24 = smov 1   ;;  %v307_v48 = vmov 1   ;;  %s418_s0 = inlined_call_operand.vmem [shape: f32[8,32], index: 0, kind: input, shape index: {}]   ;;  %s419_s1 = inlined_call_operand.vmem [shape: f32[16,32], index: 1, kind: input, shape index: {}]   ;;  %s420_s4 = inlined_call_operand.vmem [shape: f32[24,8], index: 4, kind: input, shape index: {}]   ;;  %s421_s2 = inlined_call_operand.vmem [shape: f32[8,16], index: 2, kind: input, shape index: {}]   ;;  %s422_s3 = inlined_call_operand.vmem [shape: f32[18,8], index: 3, kind: input, shape index: {}]   ;;  %s423_s5 = inlined_call_operand.vmem [shape: f32[18,8], index: 5, kind: output, shape index: {}]  }
   0x1   :  { %v22_v0 = vld [vmem:[%s418_s0] sm:$0xff]  ;;  %v21_v2 = vld [vmem:[%s419_s1 + $0x8] sm:$0xff]  ;;  %292 = vset.pattern.permute.xlu0 %v305_v11  ;;  %293 = vset.pattern.permute.xlu1 %v305_v11  ;;  %vm146_vm8 = vcmask 130048   ;;  %vm272_vm12 = vcmask 58368  }
   0x2   :  { %278 = vmatpush.xpose.msk.msra.mxu0 %vm23_vm0, %v22_v0  ;;  %v20_v1 = vld [vmem:[%s419_s1] sm:$0xff]  ;;  %v367_v35 = vld [vmem:[%s420_s4 + $0x8] sm:$0xff]  ;;  %294 = vset.pattern.permute.xlu2 %v307_v48 }
   0x3   :  { %v374_v43 = vld [vmem:[%s420_s4] sm:$0xff] }
   0x4   :  { %v145_v63 = vld [vmem:[%s421_s2] sm:$0xff] }
   0x5   :  { %279 = vmatmul.msk.f32.vlgmr.msra.gmra.mxu0 %vm23_vm0, %v20_v1 }
   0xd   :  { %280 = vmatmul.msk.f32.gmra.mxu0 %vm23_vm0, %v21_v2 }
  0x82   :  { %v350_v3 = vpop.f32.mrf.mxu0 }
  0x83   :  { %v67_v8 = vmul.f32 %v350_v3, %v350_v3  ;;  %v59_v9 = vsel %vm58_vm1, %v350_v3, 0.0 }
  0x85   :  { %v69_v10 = vsel %vm58_vm1, %v67_v8, 0.0 }
  0x8a   :  { %v352_v4 = vpop.f32.mrf.mxu0 }
  0x8b   :  { %v62_v5 = vsel %vm58_vm1, %v352_v4, 0.0  ;;  %v68_v6 = vmul.f32 %v352_v4, %v352_v4 }
  0x8c   :  { %63 = vadd.xlane.f32.xlu0 %v62_v5 }
  0x8d   :  { %v72_v7 = vsel %vm58_vm1, %v68_v6, 0.0 }
  0x8e   :  { %73 = vadd.xlane.f32.xlu1 %v72_v7  ;;  %v308_v7 = vmov 2  }
  0x94   :  { %60 = vadd.xlane.f32.xlu0 %v59_v9 }
  0x96   :  { %70 = vadd.xlane.f32.xlu1 %v69_v10 }
  0xff   :  { %v64_v12 = vpop.xlane.xlu0 %63 }
 0x100   :  { %v66_v13 = vmul.f32 0.125, %v64_v12 }
 0x101   :  { %v74_v14 = vpop.xlane.xlu1 %73 }
 0x102   :  { %v78_v15 = vmul.f32 %v66_v13, %v66_v13  ;;  %v76_v16 = vmul.f32 0.125, %v74_v14 }
 0x104   :  { %v80_v17 = vsub.f32 %v76_v16, %v78_v15 }
 0x106   :  { %v82_v18 = vmax.f32 %v80_v17, 0.0 }
 0x107   :  { %v61_v19 = vpop.xlane.xlu0 %60 }
 0x108   :  { %v84_v20 = vadd.f32 1e-05, %v82_v18  ;;  %v65_v21 = vmul.f32 0.125, %v61_v19 }
 0x109   :  { %v71_v22 = vpop.xlane.xlu1 %70 }
 0x10a   :  { %299 = vrsqrt.f32 %v84_v20  ;;  %v77_v23 = vmul.f32 %v65_v21, %v65_v21  ;;  %v75_v24 = vmul.f32 0.125, %v71_v22  ;;  %vm101_vm3 = vweird.f32 %v84_v20 }
 0x10b   :  { %v309_v22 = vmov 3  }
 0x10c   :  { %v79_v25 = vsub.f32 %v75_v24, %v77_v23 }
 0x10e   :  { %v81_v26 = vmax.f32 %v79_v25, 0.0  ;;  %v310_v25 = vmov 4  }
 0x110   :  { %v300_v27 = vpop.eup %299  ;;  %v83_v28 = vadd.f32 1e-05, %v81_v26  ;;  %v219_v26 = vld [vmem:[%s420_s4 + $0x10] sm:$0x3] }
 0x111   :  { %v96_v29 = vmul.f32 %v300_v27, %v84_v20  ;;  %vm102_vm2 = vweird.f32 %v300_v27 }
 0x112   :  { %301 = vrsqrt.f32 %v83_v28  ;;  %vm103_vm4 = vmor %vm101_vm3, %vm102_vm2  ;;  %vm91_vm6 = vweird.f32 %v83_v28 }
 0x113   :  { %v97_v30 = vmul.f32 %v300_v27, %v96_v29 }
 0x115   :  { %v98_v31 = vmul.f32 0.5, %v97_v30 }
 0x117   :  { %v99_v32 = vsub.f32 1.5, %v98_v31 }
 0x118   :  { %v302_v33 = vpop.eup %301 }
 0x119   :  { %v86_v34 = vmul.f32 %v302_v33, %v83_v28  ;;  %v100_v36 = vmul.f32 %v300_v27, %v99_v32  ;;  %vm92_vm5 = vweird.f32 %v302_v33  ;;  %v214_v32 = vld [vmem:[%s422_s3] sm:$0xff] }
 0x11a   :  { %vm93_vm7 = vmor %vm91_vm6, %vm92_vm5 }
 0x11b   :  { %v87_v37 = vmul.f32 %v302_v33, %v86_v34  ;;  %v104_v38 = vsel %vm103_vm4, %v300_v27, %v100_v36  ;;  %v216_v34 = vld [vmem:[%s422_s3 + $0x10] sm:$0x3] }
 0x11c   :  { %v106_v39 = vmul.f32 %v104_v38, %v367_v35 }
 0x11d   :  { %v88_v40 = vmul.f32 0.5, %v87_v37 }
 0x11e   :  { %126 = vperm.xlu0 %292, %v106_v39   ;;  %v108_v41 = vmul.f32 %v106_v39, %v66_v13 }
 0x11f   :  { %v89_v42 = vsub.f32 1.5, %v88_v40 }
 0x120   :  { %113 = vrot.lane.b32.xlu2 %v108_v41, %s306_s24 }
 0x121   :  { %v90_v44 = vmul.f32 %v302_v33, %v89_v42 }
 0x123   :  { %v94_v45 = vsel %vm93_vm7, %v302_v33, %v90_v44  ;;  %v215_v33 = vld [vmem:[%s422_s3 + $0x8] sm:$0xff] }
 0x124   :  { %v105_v46 = vmul.f32 %v94_v45, %v374_v43 }
 0x126   :  { %121 = vperm.xlu1 %293, %v105_v46   ;;  %v107_v47 = vmul.f32 %v105_v46, %v65_v21  ;;  %295 = vset.pattern.permute.xlu0 %v308_v7 }
 0x128   :  { %111 = vrot.lane.b32.xlu2 %v107_v47, %s306_s24 }
 0x12e   :  { %298 = vset.pattern.permute.xlu1 %v310_v25 }
 0x17a   :  { %v114_v49 = vpop.permute.xlu2 %113 }
 0x17b   :  { %v118_v50 = vsub.f32 %v367_v35, %v114_v49 }
 0x17d   :  { %138 = vperm.xlu2 %294, %v118_v50  }
 0x182   :  { %v112_v51 = vpop.permute.xlu2 %111 }
 0x183   :  { %v117_v52 = vsub.f32 %v374_v43, %v112_v51 }
 0x185   :  { %133 = vperm.xlu2 %294, %v117_v52  }
 0x18d   :  { %296 = vset.pattern.permute.xlu2 %v309_v22 }
 0x190   :  { %v127_v53 = vpop.permute.xlu0 %126 }
 0x191   :  { %v130_v54 = vmul.f32 %v127_v53, %v352_v4 }
 0x198   :  { %v122_v58 = vpop.permute.xlu1 %121 }
 0x199   :  { %v129_v59 = vmul.f32 %v122_v58, %v350_v3 }
 0x1d7   :  { %v139_v55 = vpop.permute.xlu2 %138 }
 0x1d8   :  { %v142_v56 = vadd.f32 %v139_v55, %v130_v54 }
 0x1da   :  { %v144_v57 = vmax.f32 %v142_v56, 0.0 }
 0x1dc   :  { %164 = vmatpush.msra.mxu1 %v144_v57 }
 0x1df   :  { %v134_v60 = vpop.permute.xlu2 %133 }
 0x1e0   :  { %v141_v61 = vadd.f32 %v134_v60, %v129_v59 }
 0x1e2   :  { %v143_v62 = vmax.f32 %v141_v61, 0.0 }
 0x1e4   :  { %165 = vmatpush.msra.mxu1 %v143_v62 }
 0x1e5   :  { %281 = vmatmul.msk.f32.vlgmr.msra.gmra.mxu1 %vm146_vm8, %v145_v63 }
 0x262   :  { %v167_v0 = vpop.f32.mrf.mxu1 }
 0x263   :  { %v175_v1 = vmul.f32 %v167_v0, %v167_v0  ;;  %v171_v2 = vsel %vm58_vm1, %v167_v0, 0.0 }
 0x264   :  { %172 = vadd.xlane.f32.xlu2 %v171_v2 }
 0x265   :  { %v176_v4 = vsel %vm58_vm1, %v175_v1, 0.0 }
 0x266   :  { %177 = vadd.xlane.f32.xlu1 %v176_v4 }
 0x27f   :  { %227 = vperm.xlu1 %298, %v367_v35  }
 0x2d7   :  { %v173_v5 = vpop.xlane.xlu2 %172 }
 0x2d8   :  { %v174_v3 = vmul.f32 0.125, %v173_v5 }
 0x2d9   :  { %v178_v6 = vpop.xlane.xlu1 %177 }
 0x2da   :  { %v180_v8 = vmul.f32 %v174_v3, %v174_v3  ;;  %v179_v9 = vmul.f32 0.125, %v178_v6 }
 0x2dc   :  { %v181_v10 = vsub.f32 %v179_v9, %v180_v8 }
 0x2de   :  { %v182_v11 = vmax.f32 %v181_v10, 0.0 }
 0x2e0   :  { %v183_v12 = vadd.f32 1e-05, %v182_v11 }
 0x2e2   :  { %303 = vrsqrt.f32 %v183_v12  ;;  %vm190_vm10 = vweird.f32 %v183_v12 }
 0x2e8   :  { %v304_v13 = vpop.eup %303 }
 0x2e9   :  { %v185_v14 = vmul.f32 %v304_v13, %v183_v12  ;;  %vm191_vm9 = vweird.f32 %v304_v13 }
 0x2ea   :  { %vm192_vm11 = vmor %vm190_vm10, %vm191_vm9 }
 0x2eb   :  { %v186_v15 = vmul.f32 %v304_v13, %v185_v14 }
 0x2ed   :  { %v187_v16 = vmul.f32 0.5, %v186_v15 }
 0x2ef   :  { %v188_v17 = vsub.f32 1.5, %v187_v16 }
 0x2f1   :  { %v189_v18 = vmul.f32 %v304_v13, %v188_v17  ;;  %v228_v36 = vpop.permute.xlu1 %227 }
 0x2f3   :  { %v193_v19 = vsel %vm192_vm11, %v304_v13, %v189_v18 }
 0x2f4   :  { %v194_v20 = vmul.f32 %v193_v19, %v374_v43 }
 0x2f6   :  { %v195_v21 = vmul.f32 %v194_v20, %v174_v3 }
 0x2f8   :  { %197 = vrot.lane.b32.xlu0 %v195_v21, %s306_s24 }
 0x300   :  { %203 = vperm.xlu0 %295, %v194_v20  }
 0x308   :  { %297 = vset.pattern.permute.xlu0 %v310_v25 }
 0x309   :  { %222 = vperm.xlu0 %297, %v374_v43  }
 0x311   :  { %232 = vperm.xlu0 %297, %v219_v26  }
 0x36a   :  { %v198_v23 = vpop.permute.xlu0 %197 }
 0x36b   :  { %v200_v24 = vsub.f32 %v374_v43, %v198_v23 }
 0x36d   :  { %209 = vperm.xlu2 %296, %v200_v24  }
 0x372   :  { %v204_v27 = vpop.permute.xlu0 %203 }
 0x373   :  { %v206_v28 = vmul.f32 %v204_v27, %v167_v0 }
 0x37b   :  { %v223_v35 = vpop.permute.xlu0 %222 }
 0x383   :  { %v233_v41 = vpop.permute.xlu0 %232 }
 0x3c7   :  { %v210_v29 = vpop.permute.xlu2 %209 }
 0x3c8   :  { %v212_v30 = vadd.f32 %v210_v29, %v206_v28 }
 0x3ca   :  { %v213_v31 = vmax.f32 %v212_v30, 0.0 }
 0x3cc   :  { %259 = vmatpush.msra.mxu2 %v213_v31  ;;  %285 = vmatpush.msra.mxu3 %v213_v31 }
 0x3cd   :  { %282 = vmatmul.msk.f32.vlgmr.msra.gmra.mxu2 %vm58_vm1, %v214_v32  ;;  %283 = vmatmul.msk.f32.vlgmr.msra.gmra.mxu3 %vm58_vm1, %v215_v33 }
 0x3d5   :  { %284 = vmatmul.msk.f32.gmra.mxu3 %vm58_vm1, %v216_v34 }
 0x450   :  { %v261_v37 = vpop.f32.mrf.mxu2  ;;  %v264_v38 = vpop.f32.mrf.mxu3 }
 0x451   :  { %v262_v39 = vadd.f32 %v261_v37, %v223_v35  ;;  %v265_v40 = vadd.f32 %v264_v38, %v228_v36 }
 0x453   :  { %270 = vst.msk [vmem:[%s423_s5] sm:$0xff] %vm58_vm1, %v262_v39 }
 0x454   :  { %271 = vst.msk [vmem:[%s423_s5 + $0x8] sm:$0xff] %vm58_vm1, %v265_v40 }
 0x458   :  { %v267_v42 = vpop.f32.mrf.mxu3 }
 0x459   :  { %v268_v43 = vadd.f32 %v267_v42, %v233_v41 }
 0x45b   :  { %273 = vst.msk [vmem:[%s423_s5 + $0x10] sm:$0x3] %vm272_vm12, %v268_v43 }

</bundles_post_ra>
